<compile_context>
chip_gen: v7x
topology: tpu7x:2x2x1
jax: 0.10.0
libtpu: 0.0.40
codegen_flags: <defaults>
</compile_context>

<pallas_src>
import functools

import jax
import jax.numpy as jnp
import numpy as np
from jax.experimental import pallas as pl
from jax.experimental.pallas import tpu as pltpu


def _channel_attention_kernel(x_ref, w1t_ref, w2_ref, o_ref, sum_ref, max_ref, *, inv_s):
    # x_ref block : [1, C, block_s]   (lane-dense spatial tile)
    # w1t_ref     : [C, C_hid]        (fc1 weight, transposed)
    # w2_ref      : [C, C_hid]        (fc2 weight)
    # o_ref block : [1, C, 1]
    # sum_ref/max_ref scratch : [C, 1]  (persist across the spatial grid axis)
    s_idx = pl.program_id(1)

    @pl.when(s_idx == 0)
    def _():
        sum_ref[...] = jnp.zeros_like(sum_ref)
        max_ref[...] = jnp.full_like(max_ref, -jnp.inf)

    xb = x_ref[0].astype(jnp.float32)                                   # [C, bS]
    sum_ref[...] += jnp.sum(xb, axis=-1, keepdims=True)                 # [C, 1]
    max_ref[...] = jnp.maximum(max_ref[...], jnp.max(xb, axis=-1, keepdims=True))

    @pl.when(s_idx == pl.num_programs(1) - 1)
    def _():
        w1t = w1t_ref[...]                                              # [C, C_hid]
        w2m = w2_ref[...]                                               # [C, C_hid]
        v_avg = sum_ref[...] * inv_s                                    # [C, 1]
        v_max = max_ref[...]                                            # [C, 1]

        # hidden = relu(fc1 @ v)   ->  [1, C_hid]   (sublane reduction)
        h_avg = jnp.maximum(jnp.sum(w1t * v_avg, axis=0, keepdims=True), 0.0)
        h_max = jnp.maximum(jnp.sum(w1t * v_max, axis=0, keepdims=True), 0.0)
        # out = fc2 @ hidden       ->  [C, 1]       (lane reduction)
        out_col = (jnp.sum(w2m * h_avg, axis=1, keepdims=True)
                   + jnp.sum(w2m * h_max, axis=1, keepdims=True))
        o_ref[0] = jax.nn.sigmoid(out_col).astype(o_ref.dtype)


def _pick_spatial_tile(s_total, max_tile=2048):
    """Largest lane-aligned (multiple of 128) divisor of s_total <= max_tile."""
    if s_total <= max_tile or s_total % 128 != 0:
        return s_total
    tile = (max_tile // 128) * 128
    while tile >= 128:
        if s_total % tile == 0:
            return tile
        tile -= 128
    return s_total


def channel_attention(x, w1, w2, *, block_s=None):
    """ChannelAttention forward.

    x : [N, C, D, H, W] float32
    w1: [C_hid, C, 1, 1, 1] float32   (fc1 = Conv3d(C, C//16, 1, bias=False), OIDHW)
    w2: [C, C_hid, 1, 1, 1] float32   (fc2 = Conv3d(C//16, C, 1, bias=False), OIDHW)
    returns [N, C, 1, 1, 1] float32
    """
    N, C, D, H, W = x.shape
    C_hid = w1.shape[0]
    assert w1.shape[1] == C and w2.shape[0] == C and w2.shape[1] == C_hid
    S = D * H * W
    if block_s is None:
        block_s = _pick_spatial_tile(S)
    assert S % block_s == 0, "spatial tile must divide D*H*W"
    num_s = S // block_s

    x_flat = x.reshape(N, C, S)                                        # lane-dense spatial axis
    w1_t = jnp.transpose(w1.reshape(C_hid, C)).astype(jnp.float32)     # [C, C_hid]
    w2_m = w2.reshape(C, C_hid).astype(jnp.float32)                    # [C, C_hid]

    kernel = functools.partial(_channel_attention_kernel, inv_s=1.0 / S)
    grid_spec = pltpu.PrefetchScalarGridSpec(
        num_scalar_prefetch=0,
        grid=(N, num_s),
        in_specs=[
            pl.BlockSpec((1, C, block_s), lambda n, s: (n, 0, s)),     # x tile
            pl.BlockSpec((C, C_hid), lambda n, s: (0, 0)),             # fc1.T
            pl.BlockSpec((C, C_hid), lambda n, s: (0, 0)),             # fc2
        ],
        out_specs=pl.BlockSpec((1, C, 1), lambda n, s: (n, 0, 0)),
        scratch_shapes=[
            pltpu.VMEM((C, 1), jnp.float32),                           # running sum
            pltpu.VMEM((C, 1), jnp.float32),                           # running max
        ],
    )
    out = pl.pallas_call(
        kernel,
        out_shape=jax.ShapeDtypeStruct((N, C, 1), jnp.float32),
        grid_spec=grid_spec,
        compiler_params=pltpu.CompilerParams(
            dimension_semantics=("parallel", "arbitrary"),
            vmem_limit_bytes=32 * 1024 * 1024,
        ),
    )(x_flat, w1_t, w2_m)
    return out.reshape(N, C, 1, 1, 1)


if __name__ == "__main__":
    key = jax.random.PRNGKey(0)
    kx, k1, k2 = jax.random.split(key, 3)

    # in_planes must be >= 16 for the module's hardcoded `in_planes // 16` hidden width.
    N, C, D, H, W = 2, 64, 4, 8, 16
    C_hid = C // 16
    x = jax.random.normal(kx, (N, C, D, H, W), dtype=jnp.float32)
    w1 = jax.random.normal(k1, (C_hid, C, 1, 1, 1), dtype=jnp.float32) * 0.1
    w2 = jax.random.normal(k2, (C, C_hid, 1, 1, 1), dtype=jnp.float32) * 0.1

    out = jax.block_until_ready(channel_attention(x, w1, w2, block_s=256))

    # pure-JAX reference (same semantics as the PyTorch forward)
    avg = jnp.mean(x, axis=(2, 3, 4))                                  # [N, C]
    mx = jnp.max(x, axis=(2, 3, 4))                                    # [N, C]
    w1m = w1.reshape(C_hid, C)
    w2m = w2.reshape(C, C_hid)

    def fc(v):
        return jnp.maximum(v @ w1m.T, 0.0) @ w2m.T

    ref = jax.nn.sigmoid(fc(avg) + fc(mx)).reshape(N, C, 1, 1, 1)

    assert out.shape == ref.shape == (N, C, 1, 1, 1)
    np.testing.assert_allclose(np.asarray(out), np.asarray(ref), rtol=1e-4, atol=1e-5)
    print("KERNEL_OK")
</pallas_src>

<mosaic_0001>
module attributes {stable_mosaic.version = 11 : i64} {
  func.func @_channel_attention_kernel(%arg0: i32, %arg1: i32, %arg2: memref<1x64x256xf32, #tpu.memory_space<vmem>>, %arg3: memref<64x4xf32, #tpu.memory_space<vmem>>, %arg4: memref<64x4xf32, #tpu.memory_space<vmem>>, %arg5: memref<1x64x1xf32, #tpu.memory_space<vmem>>, %arg6: memref<64x1xf32, #tpu.memory_space<vmem>>, %arg7: memref<64x1xf32, #tpu.memory_space<vmem>>) attributes {dimension_semantics = [#tpu.dimension_semantics<parallel>, #tpu.dimension_semantics<arbitrary>], iteration_bounds = array<i64: 2, 2>, scalar_prefetch = 0 : i64, scratch_operands = 2 : i64, tpu.core_type = #tpu.core_type<tc>, window_params = [{transform_indices = @transform_0, window_bounds = array<i64: 1, 64, 256>}, {pipeline_mode = #tpu.pipeline_mode<synchronous>, transform_indices = @transform_1, window_bounds = array<i64: 64, 4>}, {pipeline_mode = #tpu.pipeline_mode<synchronous>, transform_indices = @transform_2, window_bounds = array<i64: 64, 4>}, {transform_indices = @transform_3, window_bounds = array<i64: 1, 64, 1>}]} {
    %c0_i32 = arith.constant 0 : i32
    %0 = arith.cmpi eq, %arg1, %c0_i32 : i32
    %1 = arith.extui %0 : i1 to i32
    %c0_i32_0 = arith.constant 0 : i32
    %2 = arith.cmpi ne, %1, %c0_i32_0 : i32
    scf.if %2 {
      %cst_13 = arith.constant 0.000000e+00 : f32
      %18 = vector.broadcast %cst_13 : f32 to vector<64x1xf32>
      %c0_14 = arith.constant 0 : index
      %c0_15 = arith.constant 0 : index
      %19 = vector.load %arg6[%c0_14, %c0_15] : memref<64x1xf32, #tpu.memory_space<vmem>>, vector<64x1xf32>
      tpu.vector_store %arg6[%c0_14, %c0_15], %18 {strides = array<i32>} : memref<64x1xf32, #tpu.memory_space<vmem>>, vector<64x1xf32>,
      %cst_16 = arith.constant 0xFF800000 : f32
      %20 = vector.broadcast %cst_16 : f32 to vector<64x1xf32>
      %c0_17 = arith.constant 0 : index
      %c0_18 = arith.constant 0 : index
      %21 = vector.load %arg7[%c0_17, %c0_18] : memref<64x1xf32, #tpu.memory_space<vmem>>, vector<64x1xf32>
      tpu.vector_store %arg7[%c0_17, %c0_18], %20 {strides = array<i32>} : memref<64x1xf32, #tpu.memory_space<vmem>>, vector<64x1xf32>,
    } else {
    }
    %c0 = arith.constant 0 : index
    %c0_1 = arith.constant 0 : index
    %c0_2 = arith.constant 0 : index
    %3 = vector.load %arg2[%c0, %c0_1, %c0_2] : memref<1x64x256xf32, #tpu.memory_space<vmem>>, vector<1x64x256xf32>
    %4 = vector.shape_cast %3 : vector<1x64x256xf32> to vector<64x256xf32>
    %c0_3 = arith.constant 0 : index
    %c0_4 = arith.constant 0 : index
    %5 = vector.load %arg6[%c0_3, %c0_4] : memref<64x1xf32, #tpu.memory_space<vmem>>, vector<64x1xf32>
    %cst = arith.constant dense<0.000000e+00> : vector<64xf32>
    %6 = vector.multi_reduction <add>, %4, %cst [1] : vector<64x256xf32> to vector<64xf32>
    %7 = vector.shape_cast %6 : vector<64xf32> to vector<64x1xf32>
    %8 = arith.addf %5, %7 : vector<64x1xf32>
    %c0_5 = arith.constant 0 : index
    %c0_6 = arith.constant 0 : index
    %9 = vector.load %arg6[%c0_5, %c0_6] : memref<64x1xf32, #tpu.memory_space<vmem>>, vector<64x1xf32>
    tpu.vector_store %arg6[%c0_5, %c0_6], %8 {strides = array<i32>} : memref<64x1xf32, #tpu.memory_space<vmem>>, vector<64x1xf32>,
    %c0_7 = arith.constant 0 : index
    %c0_8 = arith.constant 0 : index
    %10 = vector.load %arg7[%c0_7, %c0_8] : memref<64x1xf32, #tpu.memory_space<vmem>>, vector<64x1xf32>
    %cst_9 = arith.constant dense<0xFF800000> : vector<64xf32>
    %11 = vector.multi_reduction <maximumf>, %4, %cst_9 [1] : vector<64x256xf32> to vector<64xf32>
    %12 = vector.shape_cast %11 : vector<64xf32> to vector<64x1xf32>
    %13 = arith.maximumf %10, %12 : vector<64x1xf32>
    %c0_10 = arith.constant 0 : index
    %c0_11 = arith.constant 0 : index
    %14 = vector.load %arg7[%c0_10, %c0_11] : memref<64x1xf32, #tpu.memory_space<vmem>>, vector<64x1xf32>
    tpu.vector_store %arg7[%c0_10, %c0_11], %13 {strides = array<i32>} : memref<64x1xf32, #tpu.memory_space<vmem>>, vector<64x1xf32>,
    %c1_i32 = arith.constant 1 : i32
    %15 = arith.cmpi eq, %arg1, %c1_i32 : i32
    %16 = arith.extui %15 : i1 to i32
    %c0_i32_12 = arith.constant 0 : i32
    %17 = arith.cmpi ne, %16, %c0_i32_12 : i32
    scf.if %17 {
      %c0_13 = arith.constant 0 : index
      %c0_14 = arith.constant 0 : index
      %18 = vector.load %arg3[%c0_13, %c0_14] : memref<64x4xf32, #tpu.memory_space<vmem>>, vector<64x4xf32>
      %c0_15 = arith.constant 0 : index
      %c0_16 = arith.constant 0 : index
      %19 = vector.load %arg4[%c0_15, %c0_16] : memref<64x4xf32, #tpu.memory_space<vmem>>, vector<64x4xf32>
      %c0_17 = arith.constant 0 : index
      %c0_18 = arith.constant 0 : index
      %20 = vector.load %arg6[%c0_17, %c0_18] : memref<64x1xf32, #tpu.memory_space<vmem>>, vector<64x1xf32>
      %cst_19 = arith.constant 0.001953125 : f32
      %21 = vector.broadcast %cst_19 : f32 to vector<64x1xf32>
      %22 = arith.mulf %20, %21 : vector<64x1xf32>
      %c0_20 = arith.constant 0 : index
      %c0_21 = arith.constant 0 : index
      %23 = vector.load %arg7[%c0_20, %c0_21] : memref<64x1xf32, #tpu.memory_space<vmem>>, vector<64x1xf32>
      %24 = vector.broadcast %22 : vector<64x1xf32> to vector<64x4xf32>
      %25 = arith.mulf %18, %24 : vector<64x4xf32>
      %cst_22 = arith.constant dense<0.000000e+00> : vector<4xf32>
      %26 = vector.multi_reduction <add>, %25, %cst_22 [0] : vector<64x4xf32> to vector<4xf32>
      %27 = vector.shape_cast %26 : vector<4xf32> to vector<1x4xf32>
      %cst_23 = arith.constant 0.000000e+00 : f32
      %28 = vector.broadcast %cst_23 : f32 to vector<1x4xf32>
      %29 = arith.maximumf %27, %28 : vector<1x4xf32>
      %30 = vector.broadcast %23 : vector<64x1xf32> to vector<64x4xf32>
      %31 = arith.mulf %18, %30 : vector<64x4xf32>
      %cst_24 = arith.constant dense<0.000000e+00> : vector<4xf32>
      %32 = vector.multi_reduction <add>, %31, %cst_24 [0] : vector<64x4xf32> to vector<4xf32>
      %33 = vector.shape_cast %32 : vector<4xf32> to vector<1x4xf32>
      %cst_25 = arith.constant 0.000000e+00 : f32
      %34 = vector.broadcast %cst_25 : f32 to vector<1x4xf32>
      %35 = arith.maximumf %33, %34 : vector<1x4xf32>
      %36 = vector.broadcast %29 : vector<1x4xf32> to vector<64x4xf32>
      %37 = arith.mulf %19, %36 : vector<64x4xf32>
      %cst_26 = arith.constant dense<0.000000e+00> : vector<64xf32>
      %38 = vector.multi_reduction <add>, %37, %cst_26 [1] : vector<64x4xf32> to vector<64xf32>
      %39 = vector.shape_cast %38 : vector<64xf32> to vector<64x1xf32>
      %40 = vector.broadcast %35 : vector<1x4xf32> to vector<64x4xf32>
      %41 = arith.mulf %19, %40 : vector<64x4xf32>
      %cst_27 = arith.constant dense<0.000000e+00> : vector<64xf32>
      %42 = vector.multi_reduction <add>, %41, %cst_27 [1] : vector<64x4xf32> to vector<64xf32>
      %43 = vector.shape_cast %42 : vector<64xf32> to vector<64x1xf32>
      %44 = arith.addf %39, %43 : vector<64x1xf32>
      %45 = arith.negf %44 : vector<64x1xf32>
      %46 = math.exp %45 : vector<64x1xf32>
      %cst_28 = arith.constant 1.000000e+00 : f32
      %47 = vector.broadcast %cst_28 : f32 to vector<64x1xf32>
      %48 = arith.addf %47, %46 : vector<64x1xf32>
      %49 = arith.divf %47, %48 : vector<64x1xf32>
      %c0_29 = arith.constant 0 : index
      %c0_30 = arith.constant 0 : index
      %c0_31 = arith.constant 0 : index
      %50 = vector.load %arg5[%c0_29, %c0_30, %c0_31] : memref<1x64x1xf32, #tpu.memory_space<vmem>>, vector<1x64x1xf32>
      %51 = vector.shape_cast %50 : vector<1x64x1xf32> to vector<64x1xf32>
      %52 = vector.shape_cast %49 : vector<64x1xf32> to vector<1x64x1xf32>
      tpu.vector_store %arg5[%c0_29, %c0_30, %c0_31], %52 {strides = array<i32>} : memref<1x64x1xf32, #tpu.memory_space<vmem>>, vector<1x64x1xf32>,
    } else {
    }
    return
  }
  func.func @transform_0(%arg0: i32, %arg1: i32) -> (i32, i32, i32) {
    %c0_i32 = arith.constant 0 : i32
    %c0_i32_0 = arith.constant 0 : i32
    return %arg0, %c0_i32, %arg1 : i32, i32, i32
  }
  func.func @transform_1(%arg0: i32, %arg1: i32) -> (i32, i32) {
    %c0_i32 = arith.constant 0 : i32
    %c0_i32_0 = arith.constant 0 : i32
    %c0_i32_1 = arith.constant 0 : i32
    return %c0_i32, %c0_i32_0 : i32, i32
  }
  func.func @transform_2(%arg0: i32, %arg1: i32) -> (i32, i32) {
    %c0_i32 = arith.constant 0 : i32
    %c0_i32_0 = arith.constant 0 : i32
    %c0_i32_1 = arith.constant 0 : i32
    return %c0_i32, %c0_i32_0 : i32, i32
  }
  func.func @transform_3(%arg0: i32, %arg1: i32) -> (i32, i32, i32) {
    %c0_i32 = arith.constant 0 : i32
    %c0_i32_0 = arith.constant 0 : i32
    %c0_i32_1 = arith.constant 0 : i32
    return %arg0, %c0_i32, %c0_i32_0 : i32, i32, i32
  }
}

</mosaic_0001>

<bundles_post_ra>
// kernel: tpu_custom_call.1
= control target key start
LH: loop header
LB: loop body
LE: loop exit
PB: predicated region body
PF: predicated region fallthrough
CT: control target
= control target key end

     0   :  { %8 = vsyncpa [#allocation5], 0  ;;  %s1296_s0 = inlined_call_operand.hbm [shape: f32[2,64,512], index: 0, kind: input, shape index: {}]   ;;  %s1297_s1 = inlined_call_operand.vmem [shape: f32[64,4], index: 1, kind: input, shape index: {}]   ;;  %s1298_s2 = inlined_call_operand.vmem [shape: f32[64,4], index: 2, kind: input, shape index: {}]   ;;  %s1299_s3 = inlined_call_operand.vmem [shape: f32[2,64,1], index: 3, kind: output, shape index: {}]  }
   0x1   :  { %10 = vsyncpa [#allocation5 + $0x1], 0  ;;  %s997_s12 = smov 0   ;;  %s999_s13 = smov 0  }
   0x2   :  { %s1001_s14 = smov 0   ;;  %s1003_s15 = smov 0  }
   0x3   :  { %s1005_s16 = smov 0   ;;  %s1007_s17 = smov 0  }
   0x4   :  { %s1009_s18 = smov 0   ;;  %s1011_s19 = smov 0  }
   0x5 LB: > { %s736_s20 = sadd.s32 4294967295, %s968_s19   ;;  %s25_s21 = sadd.s32 1, %s960_s17  ;;  %s968_s19 = sphi %s1011_s19, %s16_s19   ;;  %s964_s18 = sphi %s1009_s18, %s1309_s18   ;;  %s960_s17 = sphi %s1007_s17, %s1308_s17   ;;  %s956_s16 = sphi %s1005_s16, %s1307_s16   ;;  %s952_s15 = sphi %s1003_s15, %s1306_s15   ;;  %s948_s14 = sphi %s1001_s14, %s1305_s14   ;;  %s944_s13 = sphi %s999_s13, %s1304_s13   ;;  %s940_s12 = sphi %s997_s12, %s1303_s12  }
   0x6   : > { %p26_p0 = scmp.ge.s32.totalorder %s25_s21, 2  ;;  %s28_s22 = sadd.s32 1, %s964_s18 }
   0x7   : > { %s37_s23 = sadd.s32 1, %s948_s14  ;;  %p44_p1 = scmp.ne.s32.totalorder %s948_s14, %s944_s13 }
   0x8   : > { %s1311_s21 = smov (%p26_p0, %s25_s21), 0  ;;  %s1313_s22 = smov (!%p26_p0, %s28_s22), %s964_s18 }
   0x9   : > { %s33_s24 = ssub.s32 %s960_s17, %s1311_s21  ;;  %p45_p2 = scmp.eq.s32.totalorder %s968_s19, 0 }
   0xa   : > { %p30_p3 = scmp.ge.s32.totalorder %s1313_s22, 2  ;;  %p50_p4 = scmp.ne.s32.totalorder %s944_s13, %s940_s12 }
   0xb   : > { %p1048_p5 = por %p45_p2, %p44_p1  ;;  %p51_p6 = scmp.eq.s32.totalorder %s736_s20, 0 }
   0xc   : > { %s1315_s22 = smov (%p30_p3, %s1313_s22), 0  ;;  %p767_p8 = scmp.lt.s32.totalorder %s968_s19, 4 }
   0xd   : > { %p1054_p7 = por %p51_p6, %p50_p4  ;;  %s32_s27 = ssub.s32 %s964_s18, %s1315_s22 }
   0xe   : > { %s34_s28 = sor.u32 %s33_s24, %s32_s27  ;;  %s148_s29 = sand.u32 1, %s948_s14  }
   0xf   : > { %p35_p9 = scmp.eq.s32.totalorder %s34_s28, 0  ;;  %s740_s30 = sshll.u32 %s148_s29, 7 }
  0x10   : > { %s741_s4 = sshll.u32 %s960_s17, 1  ;;  %s742_s6 = sshll.u32 %s964_s18, 5 }
  0x11   : > { %s1064_s5 = scalar_select %p35_p9, %s948_s14, %s37_s23  }
  0x12   : > { %s158_s7 = sadd.s32 %s742_s6, %s741_s4  ;;  %s152_s8 = scalar_lea.vmem [#allocation4], %s740_s30 }
  0x13   : > { %s161_s9 = sshll.u32 %s152_s8, 4  ;;  %s743_s10 = sshll.u32 %s158_s7, 7  ;;  %s1067_s9 = int_to_ptr.vmem [resolvable:$true] %s161_s9 }
  0x14   : > { %s1072_s20 = scalar_lea.hbm %s1296_s0, %s743_s10  ;;  %p1078_p10 = pnand %p767_p8, %p1048_p5 }
  0x15   : > { %s1082_s24 = scalar_lea.sflag [#allocation5], %s148_s29  ;;  %s872_s27 = scalar_lea.hbm %s1072_s20, 2048 }
  0x16   : > { %p873_p11 = scmp.ne.s32.totalorder %s1072_s20, %s872_s27  ;;  %p874_p12 = pneg %p1078_p10 }
  0x17   : > { %s877_s30 = scalar_lea.hbm %s1296_s0, 8192  ;;  %p878_p1 = scmp.lt.u32.totalorder %s1072_s20, %s1296_s0 }
  0x18   : > { %p875_p13 = pnand %p874_p12, %p873_p11  ;;  %p879_p2 = scmp.lt.u32.totalorder %s877_s30, %s872_s27 }
  0x19   : > { %p881_p4 = scmp.lt.u32.totalorder %s872_s27, %s1072_s20 }
  0x1a   : > { %p876_p0 = pneg %p875_p13  ;;  %p880_p3 = por %p879_p2, %p878_p1 }
  0x1c   : > { %p882_p5 = por %p881_p4, %p880_p3 }
  0x1e   : > { %p883_p6 = pnand %p882_p5, %p876_p0 }
  0x20   : > { %886 = shalt.err (!%p883_p6)
}
  0x21   : > { %s887_s29 = scalar_lea.vmem %s1067_s9, 2048  ;;  %s970_s7 = smov [#allocation4]  }
  0x22   : > { %p888_p8 = scmp.ne.s32.totalorder %s1067_s9, %s887_s29  ;;  %s892_s8 = sshll.u32 %s970_s7, 4  ;;  %s893_s8 = int_to_ptr.vmem [resolvable:$false] %s892_s8 }
  0x23   : > { %s894_s10 = scalar_lea.vmem %s893_s8, 4096  ;;  %p895_p13 = scmp.lt.s32.totalorder %s1067_s9, %s893_s8 }
  0x24   : > { %p890_p9 = pnand %p888_p8, %p874_p12  ;;  %p896_p1 = scmp.lt.s32.totalorder %s894_s10, %s887_s29 }
  0x26   : > { %p891_p11 = pneg %p890_p9  ;;  %p897_p2 = por %p896_p1, %p895_p13 }
  0x28   : > { %p898_p3 = pnand %p897_p2, %p891_p11 }
  0x2a   : > { %901 = shalt.err (!%p898_p3)
}
  0x2b   : > { %s971_s11 = smov 512   ;;  %s972_s12 = smov 256  }
  0x2c   : > { %s973_s27 = smov 16   ;;  %p744_p12 = scmp.ge.s32.totalorder %s968_s19, 1 }
  0x2d   : > { %766 = dma.hbm_to_vmem [thread:$0]  (!%p1078_p10), %s1072_s20, 2048, %s1067_s9, %s1082_s24, %s971_s11, %s972_s12, %s973_s27  }
  0x2e   : > { %p169_p0 = scmp.lt.s32.totalorder %s968_s19, 5 }
  0x30   : > { %p170_p4 = pnand %p744_p12, %p169_p0 }
  0x31   : > { %s175_s25 = sand.u32 (!%p170_p4), 1, %s944_s13  }
  0x32   : > { %173 = sbr.rel (%p170_p4) target bundleno = 622 (0x26e), region = 32  ;;  %s745_s28 = sshll.u32 (!%p170_p4), %s175_s25, 7 }
  0x33   : > { %s176_s30 = scalar_lea.sflag (!%p170_p4), [#allocation5], %s175_s25  ;;  %s1113_s4 = scalar_lea.vmem (!%p170_p4), [#allocation4], %s745_s28 }
  0x39   : > { %935 = dma.done.wait (%p1054_p7), %s176_s30, 2048  }
  0x3a   : > { %937 = vsyncadd (%p1054_p7), %s176_s30, 4294965248  ;;  %p203_p5 = scmp.lt.s32.totalorder %s956_s16, 1  ;;  %p748_p10 = scmp.ne.s32.totalorder %s952_s15, 0 }
  0x3b   : > { %vm212_vm0 = vcmask (!%p748_p10), 7168   ;;  %v974_v0 = vmov (!%p748_p10), 0.0   ;;  %v975_v1 = vmov (!%p748_p10), -inf  }
  0x3c   : > { %s1317_s16 = smov (!%p203_p5, %s956_s16), 1  ;;  %211 = sbr.rel (%p748_p10) target bundleno = 69 (0x45), region = 40 }
  0x3d   : > { %s760_s9 = sshll.u32 %s1317_s16, 6  ;;  %213 = vst.msk [vmem:[#allocation2] sm:$0xff] (!%p748_p10), %vm212_vm0, %v974_v0  ;;  %214 = vst.msk [vmem:[#allocation2 + $0x8] sm:$0xff] (!%p748_p10), %vm212_vm0, %v974_v0 }
  0x3e   : > { %s1124_s24 = scalar_lea.vmem %s1299_s3, %s760_s9  ;;  %215 = vst.msk [vmem:[#allocation2 + $0x10] sm:$0xff] (!%p748_p10), %vm212_vm0, %v974_v0  ;;  %216 = vst.msk [vmem:[#allocation2 + $0x18] sm:$0xff] (!%p748_p10), %vm212_vm0, %v974_v0 }
  0x3f   : > { %217 = vst.msk [vmem:[#allocation2 + $0x20] sm:$0xff] (!%p748_p10), %vm212_vm0, %v974_v0  ;;  %218 = vst.msk [vmem:[#allocation2 + $0x28] sm:$0xff] (!%p748_p10), %vm212_vm0, %v974_v0 }
  0x40   : > { %219 = vst.msk [vmem:[#allocation2 + $0x30] sm:$0xff] (!%p748_p10), %vm212_vm0, %v974_v0  ;;  %220 = vst.msk [vmem:[#allocation2 + $0x38] sm:$0xff] (!%p748_p10), %vm212_vm0, %v974_v0 }
  0x41   : > { %221 = vst.msk [vmem:[#allocation3] sm:$0xff] (!%p748_p10), %vm212_vm0, %v975_v1  ;;  %222 = vst.msk [vmem:[#allocation3 + $0x8] sm:$0xff] (!%p748_p10), %vm212_vm0, %v975_v1 }
  0x42   : > { %223 = vst.msk [vmem:[#allocation3 + $0x10] sm:$0xff] (!%p748_p10), %vm212_vm0, %v975_v1  ;;  %224 = vst.msk [vmem:[#allocation3 + $0x18] sm:$0xff] (!%p748_p10), %vm212_vm0, %v975_v1 }
  0x43   : > { %225 = vst.msk [vmem:[#allocation3 + $0x20] sm:$0xff] %vm212_vm0, %v975_v1  ;;  %226 = vst.msk [vmem:[#allocation3 + $0x28] sm:$0xff] %vm212_vm0, %v975_v1 }
  0x44   : > { %227 = vst.msk [vmem:[#allocation3 + $0x30] sm:$0xff] %vm212_vm0, %v975_v1  ;;  %228 = vst.msk [vmem:[#allocation3 + $0x38] sm:$0xff] %vm212_vm0, %v975_v1 }
  0x45 PF: > { %v233_v2 = vld [vmem:[%s1113_s4 + $0x20] sm:$0xff]  ;;  %v234_v3 = vld [vmem:[%s1113_s4 + $0x28] sm:$0xff]  ;;  %v235_v7 = vld [vmem:[%s1113_s4 + $0x30] sm:$0xff]  ;;  %vm285_vm1 = vcmask 7168   ;;  %p749_p7 = scmp.ne.s32.totalorder %s952_s15, 1 }
  0x46   : > { %v229_v4 = vld [vmem:[%s1113_s4] sm:$0xff]  ;;  %v259_v5 = vadd.f32 %v234_v3, %v233_v2  ;;  %v230_v6 = vld [vmem:[%s1113_s4 + $0x8] sm:$0xff]  ;;  %v236_v8 = vld [vmem:[%s1113_s4 + $0x38] sm:$0xff]  ;;  %v308_v29 = vmax.f32 %v233_v2, %v234_v3  ;;  %vm434_vm2 = vcmask (!%p749_p7), 31744  }
  0x47   : > { %v253_v9 = vadd.f32 %v230_v6, %v229_v4  ;;  %v231_v10 = vld [vmem:[%s1113_s4 + $0x10] sm:$0xff]  ;;  %v232_v11 = vld [vmem:[%s1113_s4 + $0x18] sm:$0xff]  ;;  %v262_v12 = vadd.f32 %v236_v8, %v235_v7  ;;  %v237_v16 = vld [vmem:[%s1113_s4 + $0x40] sm:$0xff]  ;;  %v302_v27 = vmax.f32 %v229_v4, %v230_v6  ;;  %v311_v28 = vmax.f32 %v235_v7, %v236_v8 }
  0x48   : > { %260 = vadd.xlane.f32.xlu1 %v259_v5  ;;  %v256_v13 = vadd.f32 %v232_v11, %v231_v10  ;;  %v239_v14 = vld [vmem:[%s1113_s4 + $0x50] sm:$0xff]  ;;  %v240_v15 = vld [vmem:[%s1113_s4 + $0x58] sm:$0xff]  ;;  %v238_v17 = vld [vmem:[%s1113_s4 + $0x48] sm:$0xff]  ;;  %v305_v26 = vmax.f32 %v231_v10, %v232_v11 }
  0x49   : > { %254 = vadd.xlane.f32.xlu0 %v253_v9  ;;  %v268_v18 = vadd.f32 %v240_v15, %v239_v14  ;;  %v265_v19 = vadd.f32 %v238_v17, %v237_v16  ;;  %v243_v20 = vld [vmem:[%s1113_s4 + $0x70] sm:$0xff]  ;;  %v244_v21 = vld [vmem:[%s1113_s4 + $0x78] sm:$0xff]  ;;  %v241_v22 = vld [vmem:[%s1113_s4 + $0x60] sm:$0xff]  ;;  %v317_v30 = vmax.f32 %v239_v14, %v240_v15  ;;  %v314_v31 = vmax.f32 %v237_v16, %v238_v17 }
  0x4a   : > { %v242_v23 = vld [vmem:[%s1113_s4 + $0x68] sm:$0xff]  ;;  %v274_v24 = vadd.f32 %v244_v21, %v243_v20  ;;  %v323_v32 = vmax.f32 %v243_v20, %v244_v21  ;;  %v247_v34 = vld [vmem:[#allocation2 + $0x10] sm:$0xff]  ;;  %v245_v35 = vld [vmem:[#allocation2] sm:$0xff]  ;;  %v976_v20 = vmov (!%p749_p7), 0  }
  0x4b   : > { %v271_v25 = vadd.f32 %v242_v23, %v241_v22  ;;  %v320_v33 = vmax.f32 %v241_v22, %v242_v23  ;;  %v248_v40 = vld [vmem:[#allocation2 + $0x18] sm:$0xff]  ;;  %v246_v41 = vld [vmem:[#allocation2 + $0x8] sm:$0xff]  ;;  %v249_v47 = vld [vmem:[#allocation2 + $0x20] sm:$0xff]  ;;  %839 = vset.pattern.permute.xlu1 (!%p749_p7), %v976_v20  ;;  %838 = vset.pattern.permute.xlu0 (!%p749_p7), %v976_v20 }
  0x4c   : > { %263 = vadd.xlane.f32.xlu1 %v262_v12  ;;  %v250_v46 = vld [vmem:[#allocation2 + $0x28] sm:$0xff]  ;;  %v252_v52 = vld [vmem:[#allocation2 + $0x38] sm:$0xff]  ;;  %v251_v53 = vld [vmem:[#allocation2 + $0x30] sm:$0xff] }
  0x4d   : > { %257 = vadd.xlane.f32.xlu0 %v256_v13  ;;  %v295_v58 = vld [vmem:[#allocation3 + $0x8] sm:$0xff]  ;;  %v294_v59 = vld [vmem:[#allocation3] sm:$0xff]  ;;  %v297_v0 = vld [vmem:[#allocation3 + $0x18] sm:$0xff] }
  0x4e   : > { %v296_v1 = vld [vmem:[#allocation3 + $0x10] sm:$0xff]  ;;  %v299_v6 = vld [vmem:[#allocation3 + $0x28] sm:$0xff]  ;;  %v298_v7 = vld [vmem:[#allocation3 + $0x20] sm:$0xff] }
  0x4f   : > { %v301_v12 = vld [vmem:[#allocation3 + $0x38] sm:$0xff]  ;;  %v300_v13 = vld [vmem:[#allocation3 + $0x30] sm:$0xff] }
  0x50   : > { %269 = vadd.xlane.f32.xlu1 %v268_v18 }
  0x51   : > { %266 = vadd.xlane.f32.xlu0 %v265_v19 }
  0x54   : > { %275 = vadd.xlane.f32.xlu1 %v274_v24 }
  0x55   : > { %272 = vadd.xlane.f32.xlu0 %v271_v25 }
  0x58   : > { %306 = vmax.xlane.f32.xlu1 %v305_v26 }
  0x59   : > { %303 = vmax.xlane.f32.xlu0 %v302_v27 }
  0x5c   : > { %312 = vmax.xlane.f32.xlu1 %v311_v28 }
  0x5d   : > { %309 = vmax.xlane.f32.xlu0 %v308_v29 }
  0x60   : > { %318 = vmax.xlane.f32.xlu1 %v317_v30 }
  0x61   : > { %315 = vmax.xlane.f32.xlu0 %v314_v31 }
  0x64   : > { %324 = vmax.xlane.f32.xlu1 %v323_v32 }
  0x65   : > { %321 = vmax.xlane.f32.xlu0 %v320_v33 }
  0xd5   : > { %v261_v36 = vpop.xlane.xlu1 %260 }
  0xd6   : > { %v279_v37 = vadd.f32 %v261_v36, %v247_v34  ;;  %v255_v38 = vpop.xlane.xlu0 %254 }
  0xd7   : > { %v277_v39 = vadd.f32 %v255_v38, %v245_v35 }
  0xd8   : > { %288 = vst.msk [vmem:[#allocation2 + $0x10] sm:$0xff] %vm285_vm1, %v279_v37 }
  0xd9   : > { %286 = vst.msk [vmem:[#allocation2] sm:$0xff] %vm285_vm1, %v277_v39  ;;  %v264_v42 = vpop.xlane.xlu1 %263 }
  0xda   : > { %v280_v43 = vadd.f32 %v264_v42, %v248_v40  ;;  %v258_v44 = vpop.xlane.xlu0 %257 }
  0xdb   : > { %v278_v45 = vadd.f32 %v258_v44, %v246_v41 }
  0xdc   : > { %289 = vst.msk [vmem:[#allocation2 + $0x18] sm:$0xff] %vm285_vm1, %v280_v43 }
  0xdd   : > { %287 = vst.msk [vmem:[#allocation2 + $0x8] sm:$0xff] %vm285_vm1, %v278_v45  ;;  %v270_v48 = vpop.xlane.xlu1 %269 }
  0xde   : > { %v282_v49 = vadd.f32 %v270_v48, %v250_v46  ;;  %v267_v50 = vpop.xlane.xlu0 %266  ;;  %v346_v48 = vld [vmem:[%s1297_s1] sm:$0xff] (!%p749_p7) }
  0xdf   : > { %v281_v51 = vadd.f32 %v267_v50, %v249_v47  ;;  %v364_v25 = vld [vmem:[#allocation2 + $0x10] sm:$0xff] (!%p749_p7) }
  0xe0   : > { %291 = vst.msk [vmem:[#allocation2 + $0x28] sm:$0xff] %vm285_vm1, %v282_v49  ;;  %v362_v19 = vld [vmem:[#allocation2] sm:$0xff] (!%p749_p7)  ;;  %v372_v27 = vmul.f32 (!%p749_p7), 0.001953125, %v364_v25  ;;  %v347_v49 = vld [vmem:[%s1297_s1 + $0x8] sm:$0xff] (!%p749_p7) }
  0xe1   : > { %290 = vst.msk [vmem:[#allocation2 + $0x20] sm:$0xff] %vm285_vm1, %v281_v51  ;;  %v276_v54 = vpop.xlane.xlu1 %275  ;;  %v370_v21 = vmul.f32 (!%p749_p7), 0.001953125, %v362_v19 }
  0xe2   : > { %v284_v55 = vadd.f32 %v276_v54, %v252_v52  ;;  %v273_v56 = vpop.xlane.xlu0 %272 }
  0xe3   : > { %v283_v57 = vadd.f32 %v273_v56, %v251_v53  ;;  %388 = vperm.xlu0 (!%p749_p7), %838, %v370_v21   ;;  %v365_v28 = vld [vmem:[#allocation2 + $0x18] sm:$0xff] (!%p749_p7)  ;;  %v348_v53 = vld [vmem:[%s1297_s1 + $0x10] sm:$0xff] (!%p749_p7) }
  0xe4   : > { %293 = vst.msk [vmem:[#allocation2 + $0x38] sm:$0xff] %vm285_vm1, %v284_v55  ;;  %v363_v22 = vld [vmem:[#allocation2 + $0x8] sm:$0xff] (!%p749_p7)  ;;  %v373_v30 = vmul.f32 (!%p749_p7), 0.001953125, %v365_v28  ;;  %v352_v21 = vld [vmem:[%s1297_s1 + $0x30] sm:$0xff] (!%p749_p7) }
  0xe5   : > { %292 = vst.msk [vmem:[#allocation2 + $0x30] sm:$0xff] %vm285_vm1, %v283_v57  ;;  %v307_v60 = vpop.xlane.xlu1 %306  ;;  %v371_v24 = vmul.f32 (!%p749_p7), 0.001953125, %v363_v22 }
  0xe6   : > { %v327_v61 = vmax.f32 %v295_v58, %v307_v60  ;;  %v304_v62 = vpop.xlane.xlu0 %303  ;;  %v349_v60 = vld [vmem:[%s1297_s1 + $0x18] sm:$0xff] (!%p749_p7) }
  0xe7   : > { %v326_v63 = vmax.f32 %v294_v59, %v304_v62  ;;  %393 = vperm.xlu0 (!%p749_p7), %838, %v371_v24   ;;  %v367_v34 = vld [vmem:[#allocation2 + $0x28] sm:$0xff] (!%p749_p7) }
  0xe8   : > { %335 = vst.msk [vmem:[#allocation3 + $0x8] sm:$0xff] %vm285_vm1, %v327_v61  ;;  %v366_v31 = vld [vmem:[#allocation2 + $0x20] sm:$0xff] (!%p749_p7)  ;;  %v375_v36 = vmul.f32 (!%p749_p7), 0.001953125, %v367_v34 }
  0xe9   : > { %334 = vst.msk [vmem:[#allocation3] sm:$0xff] %vm285_vm1, %v326_v63  ;;  %v313_v2 = vpop.xlane.xlu1 %312  ;;  %v374_v33 = vmul.f32 (!%p749_p7), 0.001953125, %v366_v31 }
  0xea   : > { %v329_v3 = vmax.f32 %v297_v0, %v313_v2  ;;  %v310_v4 = vpop.xlane.xlu0 %309  ;;  %v350_v0 = vld [vmem:[%s1297_s1 + $0x20] sm:$0xff] (!%p749_p7) }
  0xeb   : > { %v328_v5 = vmax.f32 %v296_v1, %v310_v4  ;;  %398 = vperm.xlu0 (!%p749_p7), %838, %v372_v27   ;;  %v369_v40 = vld [vmem:[#allocation2 + $0x38] sm:$0xff] (!%p749_p7) }
  0xec   : > { %337 = vst.msk [vmem:[#allocation3 + $0x18] sm:$0xff] %vm285_vm1, %v329_v3  ;;  %v368_v37 = vld [vmem:[#allocation2 + $0x30] sm:$0xff] (!%p749_p7)  ;;  %v377_v42 = vmul.f32 (!%p749_p7), 0.001953125, %v369_v40 }
  0xed   : > { %336 = vst.msk [vmem:[#allocation3 + $0x10] sm:$0xff] %vm285_vm1, %v328_v5  ;;  %v319_v8 = vpop.xlane.xlu1 %318  ;;  %v376_v39 = vmul.f32 (!%p749_p7), 0.001953125, %v368_v37 }
  0xee   : > { %v331_v9 = vmax.f32 %v299_v6, %v319_v8  ;;  %v316_v10 = vpop.xlane.xlu0 %315 }
  0xef   : > { %v330_v11 = vmax.f32 %v298_v7, %v316_v10  ;;  %345 = sbr.rel (%p749_p7) target bundleno = 622 (0x26e), region = 44  ;;  %v379_v23 = vld [vmem:[#allocation3 + $0x8] sm:$0xff] (!%p749_p7)  ;;  %403 = vperm.xlu0 (!%p749_p7), %838, %v373_v30  }
  0xf0   : > { %339 = vst.msk [vmem:[#allocation3 + $0x28] sm:$0xff] %vm285_vm1, %v331_v9  ;;  %v378_v18 = vld [vmem:[#allocation3] sm:$0xff] (!%p749_p7)  ;;  %v351_v7 = vld [vmem:[%s1297_s1 + $0x28] sm:$0xff] (!%p749_p7) }
  0xf1   : > { %338 = vst.msk [vmem:[#allocation3 + $0x20] sm:$0xff] %vm285_vm1, %v330_v11  ;;  %v325_v14 = vpop.xlane.xlu1 %324  ;;  %459 = vperm.xlu1 (!%p749_p7), %839, %v378_v18  }
  0xf2   : > { %v333_v15 = vmax.f32 %v301_v12, %v325_v14  ;;  %v322_v16 = vpop.xlane.xlu0 %321 }
  0xf3   : > { %v332_v17 = vmax.f32 %v300_v13, %v322_v16  ;;  %v381_v29 = vld [vmem:[#allocation3 + $0x18] sm:$0xff] (!%p749_p7)  ;;  %408 = vperm.xlu0 (!%p749_p7), %838, %v374_v33  }
  0xf4   : > { %341 = vst.msk [vmem:[#allocation3 + $0x38] sm:$0xff] %vm285_vm1, %v333_v15  ;;  %v380_v26 = vld [vmem:[#allocation3 + $0x10] sm:$0xff] (!%p749_p7)  ;;  %v353_v33 = vld [vmem:[%s1297_s1 + $0x38] sm:$0xff] (!%p749_p7) }
  0xf5   : > { %340 = vst.msk [vmem:[#allocation3 + $0x30] sm:$0xff] %vm285_vm1, %v332_v17  ;;  %464 = vperm.xlu1 (!%p749_p7), %839, %v379_v23  }
  0xf7   : > { %v383_v35 = vld [vmem:[#allocation3 + $0x28] sm:$0xff]  ;;  %413 = vperm.xlu0 %838, %v375_v36  }
  0xf8   : > { %v382_v32 = vld [vmem:[#allocation3 + $0x20] sm:$0xff] }
  0xf9   : > { %469 = vperm.xlu1 %839, %v380_v26  }
  0xfb   : > { %418 = vperm.xlu0 %838, %v376_v39   ;;  %v385_v41 = vld [vmem:[#allocation3 + $0x38] sm:$0xff] }
  0xfc   : > { %v384_v38 = vld [vmem:[#allocation3 + $0x30] sm:$0xff] }
  0xfd   : > { %474 = vperm.xlu1 %839, %v381_v29  }
  0xff   : > { %423 = vperm.xlu0 %838, %v377_v42  }
 0x101   : > { %479 = vperm.xlu1 %839, %v382_v32  }
 0x105   : > { %484 = vperm.xlu1 %839, %v383_v35  }
 0x109   : > { %489 = vperm.xlu1 %839, %v384_v38  }
 0x10d   : > { %494 = vperm.xlu1 %839, %v385_v41  }
 0x162   : > { %v389_v44 = vpop.permute.xlu0 %388 }
 0x163   : > { %v426_v51 = vmul.f32 %v389_v44, %v346_v48 }
 0x165   : > { %v435_v57 = vsel %vm434_vm2, %v426_v51, 0.0 }
 0x166   : > { %v394_v46 = vpop.permute.xlu0 %393 }
 0x167   : > { %v427_v52 = vmul.f32 %v394_v46, %v347_v49 }
 0x169   : > { %v436_v58 = vsel %vm434_vm2, %v427_v52, 0.0 }
 0x16a   : > { %v399_v50 = vpop.permute.xlu0 %398  ;;  %v437_v2 = vadd.f32 %v436_v58, %v435_v57 }
 0x16b   : > { %v428_v59 = vmul.f32 %v399_v50, %v348_v53 }
 0x16d   : > { %v438_v5 = vsel %vm434_vm2, %v428_v59, 0.0 }
 0x16e   : > { %v404_v56 = vpop.permute.xlu0 %403  ;;  %v439_v14 = vadd.f32 %v438_v5, %v437_v2 }
 0x16f   : > { %v429_v6 = vmul.f32 %v404_v56, %v349_v60 }
 0x170   : > { %v460_v43 = vpop.permute.xlu1 %459 }
 0x171   : > { %v497_v61 = vmul.f32 %v460_v43, %v346_v48  ;;  %v440_v19 = vsel %vm434_vm2, %v429_v6, 0.0 }
 0x172   : > { %v409_v4 = vpop.permute.xlu0 %408  ;;  %v441_v26 = vadd.f32 %v440_v19, %v439_v14 }
 0x173   : > { %v505_v8 = vsel %vm434_vm2, %v497_v61, 0.0  ;;  %v430_v12 = vmul.f32 %v409_v4, %v350_v0  ;;  %v354_v61 = vld [vmem:[%s1298_s2] sm:$0xff] }
 0x174   : > { %v465_v45 = vpop.permute.xlu1 %464 }
 0x175   : > { %v498_v55 = vmul.f32 %v465_v45, %v347_v49  ;;  %v442_v24 = vsel %vm434_vm2, %v430_v12, 0.0 }
 0x176   : > { %v414_v17 = vpop.permute.xlu0 %413  ;;  %v443_v34 = vadd.f32 %v442_v24, %v441_v26 }
 0x177   : > { %v506_v1 = vsel %vm434_vm2, %v498_v55, 0.0  ;;  %v431_v20 = vmul.f32 %v414_v17, %v351_v7 }
 0x178   : > { %v470_v47 = vpop.permute.xlu1 %469  ;;  %v507_v11 = vadd.f32 %v506_v1, %v505_v8  ;;  %v359_v8 = vld [vmem:[%s1298_s2 + $0x28] sm:$0xff] }
 0x179   : > { %v499_v62 = vmul.f32 %v470_v47, %v348_v53  ;;  %v444_v31 = vsel %vm434_vm2, %v431_v20, 0.0 }
 0x17a   : > { %v419_v29 = vpop.permute.xlu0 %418  ;;  %v445_v39 = vadd.f32 %v444_v31, %v443_v34 }
 0x17b   : > { %v508_v9 = vsel %vm434_vm2, %v499_v62, 0.0  ;;  %v432_v32 = vmul.f32 %v419_v29, %v352_v21 }
 0x17c   : > { %v475_v54 = vpop.permute.xlu1 %474  ;;  %v509_v18 = vadd.f32 %v508_v9, %v507_v11  ;;  %v358_v9 = vld [vmem:[%s1298_s2 + $0x20] sm:$0xff] }
 0x17d   : > { %v500_v3 = vmul.f32 %v475_v54, %v349_v60  ;;  %v446_v37 = vsel %vm434_vm2, %v432_v32, 0.0  ;;  %v355_v60 = vld [vmem:[%s1298_s2 + $0x8] sm:$0xff]  ;;  %v361_v32 = vld [vmem:[%s1298_s2 + $0x38] sm:$0xff] }
 0x17e   : > { %v424_v41 = vpop.permute.xlu0 %423  ;;  %v447_v44 = vadd.f32 %v446_v37, %v445_v39 }
 0x17f   : > { %v510_v15 = vsel %vm434_vm2, %v500_v3, 0.0  ;;  %v433_v43 = vmul.f32 %v424_v41, %v353_v33 }
 0x180   : > { %v480_v63 = vpop.permute.xlu1 %479  ;;  %v511_v23 = vadd.f32 %v510_v15, %v509_v18 }
 0x181   : > { %v501_v10 = vmul.f32 %v480_v63, %v350_v0  ;;  %v448_v47 = vsel %vm434_vm2, %v433_v43, 0.0  ;;  %v357_v63 = vld [vmem:[%s1298_s2 + $0x18] sm:$0xff]  ;;  %v356_v0 = vld [vmem:[%s1298_s2 + $0x10] sm:$0xff] }
 0x182   : > { %v449_v48 = vadd.f32 %v448_v47, %v447_v44 }
 0x183   : > { %v512_v22 = vsel %vm434_vm2, %v501_v10, 0.0 }
 0x184   : > { %v485_v13 = vpop.permute.xlu1 %484  ;;  %v513_v30 = vadd.f32 %v512_v22, %v511_v23  ;;  %v450_v50 = vrot.slane %v449_v48, 4  ;;  %v360_v23 = vld [vmem:[%s1298_s2 + $0x30] sm:$0xff] }
 0x185   : > { %v502_v16 = vmul.f32 %v485_v13, %v351_v7 }
 0x186   : > { %v451_v52 = vadd.f32 %v450_v50, %v449_v48 }
 0x187   : > { %v514_v27 = vsel %vm434_vm2, %v502_v16, 0.0 }
 0x188   : > { %v490_v25 = vpop.permute.xlu1 %489  ;;  %v515_v36 = vadd.f32 %v514_v27, %v513_v30  ;;  %v452_v54 = vrot.slane %v451_v52, 2 }
 0x189   : > { %v503_v28 = vmul.f32 %v490_v25, %v352_v21 }
 0x18a   : > { %v453_v56 = vadd.f32 %v452_v54, %v451_v52 }
 0x18b   : > { %v516_v35 = vsel %vm434_vm2, %v503_v28, 0.0 }
 0x18c   : > { %v495_v38 = vpop.permute.xlu1 %494  ;;  %v517_v42 = vadd.f32 %v516_v35, %v515_v36  ;;  %v454_v59 = vrot.slane %v453_v56, 1 }
 0x18d   : > { %v504_v40 = vmul.f32 %v495_v38, %v353_v33 }
 0x18e   : > { %v455_v3 = vadd.f32 %v454_v59, %v453_v56 }
 0x18f   : > { %v518_v45 = vsel %vm434_vm2, %v504_v40, 0.0 }
 0x190   : > { %v519_v46 = vadd.f32 %v518_v45, %v517_v42  ;;  %v456_v10 = vmax.f32 %v455_v3, 0.0 }
 0x192   : > { %v520_v49 = vrot.slane %v519_v46, 4  ;;  %v528_v17 = vmul.f32 %v456_v10, %v355_v60  ;;  %v527_v18 = vmul.f32 %v456_v10, %v354_v61  ;;  %v531_v21 = vmul.f32 %v456_v10, %v358_v9 }
 0x193   : > { %v529_v22 = vmul.f32 %v456_v10, %v356_v0  ;;  %v533_v26 = vmul.f32 %v456_v10, %v360_v23  ;;  %v530_v27 = vmul.f32 %v456_v10, %v357_v63  ;;  %v532_v31 = vmul.f32 %v456_v10, %v359_v8 }
 0x194   : > { %v521_v51 = vadd.f32 %v520_v49, %v519_v46  ;;  %v538_v19 = vsel %vm434_vm2, %v528_v17, 0.0  ;;  %v535_v20 = vsel %vm434_vm2, %v527_v18, 0.0  ;;  %v547_v24 = vsel %vm434_vm2, %v531_v21, 0.0 }
 0x195   : > { %v541_v25 = vsel %vm434_vm2, %v529_v22, 0.0  ;;  %v553_v28 = vsel %vm434_vm2, %v533_v26, 0.0  ;;  %v544_v29 = vsel %vm434_vm2, %v530_v27, 0.0  ;;  %v550_v34 = vsel %vm434_vm2, %v532_v31, 0.0 }
 0x196   : > { %v522_v53 = vrot.slane %v521_v51, 2  ;;  %v534_v35 = vmul.f32 %v456_v10, %v361_v32 }
 0x198   : > { %v523_v55 = vadd.f32 %v522_v53, %v521_v51  ;;  %v556_v36 = vsel %vm434_vm2, %v534_v35, 0.0 }
 0x19a   : > { %v524_v57 = vrot.slane %v523_v55, 1 }
 0x19c   : > { %v525_v58 = vadd.f32 %v524_v57, %v523_v55 }
 0x19e   : > { %v526_v62 = vmax.f32 %v525_v58, 0.0 }
 0x1a0   : > { %v560_v1 = vmul.f32 %v526_v62, %v355_v60  ;;  %v559_v2 = vmul.f32 %v526_v62, %v354_v61  ;;  %v562_v6 = vmul.f32 %v526_v62, %v357_v63  ;;  %v561_v7 = vmul.f32 %v526_v62, %v356_v0 }
 0x1a1   : > { %v564_v13 = vmul.f32 %v526_v62, %v359_v8  ;;  %v563_v14 = vmul.f32 %v526_v62, %v358_v9  ;;  %v565_v30 = vmul.f32 %v526_v62, %v360_v23  ;;  %v566_v37 = vmul.f32 %v526_v62, %v361_v32 }
 0x1a2   : > { %v570_v4 = vsel %vm434_vm2, %v560_v1, 0.0  ;;  %v567_v5 = vsel %vm434_vm2, %v559_v2, 0.0  ;;  %v576_v11 = vsel %vm434_vm2, %v562_v6, 0.0  ;;  %v573_v12 = vsel %vm434_vm2, %v561_v7, 0.0 }
 0x1a3   : > { %571 = vadd.xlane.f32.xlu0 %v570_v4  ;;  %568 = vadd.xlane.f32.xlu1 %v567_v5  ;;  %v582_v15 = vsel %vm434_vm2, %v564_v13, 0.0  ;;  %v579_v16 = vsel %vm434_vm2, %v563_v14, 0.0  ;;  %v585_v33 = vsel %vm434_vm2, %v565_v30, 0.0  ;;  %v588_v38 = vsel %vm434_vm2, %v566_v37, 0.0 }
 0x1a7   : > { %577 = vadd.xlane.f32.xlu0 %v576_v11  ;;  %574 = vadd.xlane.f32.xlu1 %v573_v12 }
 0x1ab   : > { %583 = vadd.xlane.f32.xlu0 %v582_v15  ;;  %580 = vadd.xlane.f32.xlu1 %v579_v16 }
 0x1af   : > { %539 = vadd.xlane.f32.xlu1 %v538_v19  ;;  %536 = vadd.xlane.f32.xlu0 %v535_v20 }
 0x1b3   : > { %548 = vadd.xlane.f32.xlu1 %v547_v24  ;;  %542 = vadd.xlane.f32.xlu0 %v541_v25 }
 0x1b7   : > { %554 = vadd.xlane.f32.xlu1 %v553_v28  ;;  %545 = vadd.xlane.f32.xlu0 %v544_v29 }
 0x1bb   : > { %586 = vadd.xlane.f32.xlu1 %v585_v33  ;;  %551 = vadd.xlane.f32.xlu0 %v550_v34 }
 0x1bf   : > { %557 = vadd.xlane.f32.xlu0 %v556_v36 }
 0x1c3   : > { %589 = vadd.xlane.f32.xlu0 %v588_v38 }
 0x230   : > { %v572_v39 = vpop.xlane.xlu0 %571  ;;  %v569_v40 = vpop.xlane.xlu1 %568 }
 0x234   : > { %v578_v41 = vpop.xlane.xlu0 %577  ;;  %v575_v42 = vpop.xlane.xlu1 %574 }
 0x238   : > { %v584_v43 = vpop.xlane.xlu0 %583  ;;  %v581_v44 = vpop.xlane.xlu1 %580 }
 0x23c   : > { %v540_v45 = vpop.xlane.xlu1 %539  ;;  %v537_v46 = vpop.xlane.xlu0 %536 }
 0x23d   : > { %v592_v47 = vadd.f32 %v572_v39, %v540_v45  ;;  %v591_v48 = vadd.f32 %v569_v40, %v537_v46 }
 0x23f   : > { %v751_v49 = vmul.f32 -1.442695, %v592_v47  ;;  %v750_v50 = vmul.f32 -1.442695, %v591_v48 }
 0x240   : > { %v549_v51 = vpop.xlane.xlu1 %548  ;;  %v543_v52 = vpop.xlane.xlu0 %542 }
 0x241   : > { %840 = vpow2.f32 %v751_v49  ;;  %v595_v53 = vadd.f32 %v581_v44, %v549_v51  ;;  %v593_v54 = vadd.f32 %v575_v42, %v543_v52 }
 0x242   : > { %842 = vpow2.f32 %v750_v50 }
 0x243   : > { %v754_v55 = vmul.f32 -1.442695, %v595_v53  ;;  %v752_v56 = vmul.f32 -1.442695, %v593_v54 }
 0x244   : > { %v555_v57 = vpop.xlane.xlu1 %554  ;;  %v546_v58 = vpop.xlane.xlu0 %545 }
 0x245   : > { %844 = vpow2.f32 %v754_v55  ;;  %v594_v59 = vadd.f32 %v578_v41, %v546_v58 }
 0x246   : > { %846 = vpow2.f32 %v752_v56 }
 0x247   : > { %v753_v60 = vmul.f32 -1.442695, %v594_v59 }
 0x248   : > { %v587_v61 = vpop.xlane.xlu1 %586  ;;  %v552_v62 = vpop.xlane.xlu0 %551 }
 0x249   : > { %848 = vpow2.f32 %v753_v60  ;;  %v597_v63 = vadd.f32 %v587_v61, %v555_v57  ;;  %v596_v0 = vadd.f32 %v584_v43, %v552_v62 }
 0x24b   : > { %v841_v1 = vpop.eup %840  ;;  %v756_v2 = vmul.f32 -1.442695, %v597_v63  ;;  %v755_v5 = vmul.f32 -1.442695, %v596_v0 }
 0x24c   : > { %v843_v3 = vpop.eup %842  ;;  %v624_v4 = vadd.f32 1.0, %v841_v1  ;;  %v558_v6 = vpop.xlane.xlu0 %557 }
 0x24d   : > { %v623_v7 = vadd.f32 1.0, %v843_v3  ;;  %850 = vpow2.f32 %v756_v2 }
 0x24e   : > { %852 = vrcp.f32 %v624_v4 }
 0x24f   : > { %v845_v8 = vpop.eup %844  ;;  %854 = vrcp.f32 %v623_v7 }
 0x250   : > { %v847_v9 = vpop.eup %846  ;;  %v627_v10 = vadd.f32 1.0, %v845_v8  ;;  %856 = vpow2.f32 %v755_v5  ;;  %v590_v11 = vpop.xlane.xlu0 %589 }
 0x251   : > { %v625_v12 = vadd.f32 1.0, %v847_v9  ;;  %v598_v13 = vadd.f32 %v590_v11, %v558_v6 }
 0x252   : > { %858 = vrcp.f32 %v627_v10 }
 0x253   : > { %v849_v14 = vpop.eup %848  ;;  %860 = vrcp.f32 %v625_v12  ;;  %v757_v15 = vmul.f32 -1.442695, %v598_v13 }
 0x254   : > { %v626_v16 = vadd.f32 1.0, %v849_v14 }
 0x255   : > { %862 = vpow2.f32 %v757_v15 }
 0x256   : > { %864 = vrcp.f32 %v626_v16 }
 0x257   : > { %v851_v17 = vpop.eup %850 }
 0x258   : > { %v853_v18 = vpop.eup %852  ;;  %v629_v19 = vadd.f32 1.0, %v851_v17 }
 0x259   : > { %v855_v20 = vpop.eup %854  ;;  %648 = vst.msk [vmem:[%s1124_s24 + $0x8] sm:$0xff] %vm285_vm1, %v853_v18 }
 0x25a   : > { %v857_v21 = vpop.eup %856  ;;  %647 = vst.msk [vmem:[%s1124_s24] sm:$0xff] %vm285_vm1, %v855_v20  ;;  %866 = vrcp.f32 %v629_v19 }
 0x25b   : > { %v628_v22 = vadd.f32 1.0, %v857_v21 }
 0x25c   : > { %v859_v23 = vpop.eup %858 }
 0x25d   : > { %v861_v24 = vpop.eup %860  ;;  %651 = vst.msk [vmem:[%s1124_s24 + $0x20] sm:$0xff] %vm285_vm1, %v859_v23  ;;  %868 = vrcp.f32 %v628_v22 }
 0x25e   : > { %649 = vst.msk [vmem:[%s1124_s24 + $0x10] sm:$0xff] %vm285_vm1, %v861_v24 }
 0x25f   : > { %v863_v25 = vpop.eup %862 }
 0x260   : > { %v865_v26 = vpop.eup %864  ;;  %v630_v27 = vadd.f32 1.0, %v863_v25 }
 0x261   : > { %650 = vst.msk [vmem:[%s1124_s24 + $0x18] sm:$0xff] %vm285_vm1, %v865_v26 }
 0x262   : > { %870 = vrcp.f32 %v630_v27 }
 0x264   : > { %v867_v28 = vpop.eup %866 }
 0x265   : > { %653 = vst.msk [vmem:[%s1124_s24 + $0x30] sm:$0xff] %vm285_vm1, %v867_v28 }
 0x267   : > { %v869_v29 = vpop.eup %868 }
 0x268   : > { %652 = vst.msk [vmem:[%s1124_s24 + $0x28] sm:$0xff] %vm285_vm1, %v869_v29 }
 0x26c   : > { %v871_v30 = vpop.eup %870 }
 0x26d   : > { %654 = vst.msk [vmem:[%s1124_s24 + $0x38] sm:$0xff] %vm285_vm1, %v871_v30 }
 0x26e PF: > { %s16_s19 = sadd.s32 1, %s968_s19   ;;  %s1303_s12 = smov %s944_s13 }
 0x26f   : > { %p13_p6 = scmp.ge.s32.totalorder %s16_s19, 6   ;;  %s1304_s13 = smov %s948_s14 }
 0x270   : > { %s1305_s14 = smov %s1064_s5  ;;  %s1306_s15 = smov %s960_s17 }
 0x271   : > { %s1307_s16 = smov %s964_s18  ;;  %s1308_s17 = smov %s1311_s21 }
 0x272   : > { %s1309_s18 = smov %s1315_s22  ;;  %15 = sbr.rel (!%p13_p6) target bundleno = 5 (0x5), region = 80 }
 0x279   :  { %676 = vsyncpa [#allocation5], 1 }
 0x27a   :  { %678 = vsyncpa [#allocation5 + $0x1], 1 }

</bundles_post_ra>
